<compile_context>
chip_gen: v7x
topology: tpu7x:2x2x1
jax: 0.10.0
libtpu: 0.0.40
codegen_flags: <defaults>
</compile_context>

<pallas_src>
import math

import jax
import jax.numpy as jnp
from jax.experimental import pallas as pl
from jax.experimental.pallas import tpu as pltpu


def _cdiv(a: int, b: int) -> int:
    return -(-a // b)


def _vmem_capacity_bytes() -> int:
    """Per-TensorCore VMEM capacity; conservative 64 MiB if the query fails."""
    try:
        info = pltpu.get_tpu_info()
        cap = int(getattr(info, "vmem_capacity_bytes", 0) or 0)
        if cap > 0:
            return cap
    except Exception:
        pass
    return 64 * 1024 * 1024  # smallest current part (v7x) -> safe everywhere


def _sublane_pack(dtype) -> int:
    # Sublane packing: 8 rows per vreg for 32-bit, 16 for 16-bit, 32 for 8-bit.
    itemsize = jnp.dtype(dtype).itemsize
    return max(8, 32 // max(itemsize, 1))


def _fit_tile(desired: int, dim: int, pack: int) -> int:
    """Largest tile <= desired that is a multiple of `pack`, else the full dim.

    The full dimension is always a legal block extent; pack multiples keep the
    (8, 128) layout rule satisfied for partial tiles. Tiles need not divide
    `dim` -- the grid uses ceiling division and the ragged edge is masked.
    """
    if desired >= dim:
        return dim
    t = (desired // pack) * pack
    if t < pack:
        t = pack
    return min(t, dim)


def _balanced_tiles(C: int, T: int, row_bytes: int, pack: int, target_block: int):
    """Balanced (tC, tT): both the input (tT*D) and output (tC*D) runs long."""
    rows_budget = max(target_block // row_bytes, pack)
    base = max(int(math.isqrt(rows_budget)), pack)
    tT = _fit_tile(base, T, pack)
    tC = _fit_tile(base, C, pack)
    # If one axis is fully covered with fewer than `base` rows, spend the
    # leftover row budget on the other axis (keeps blocks near the target size
    # and DMA runs long when C or T is small).
    if tT >= T and tC < C:
        tC = _fit_tile(max(rows_budget // max(tT, 1), base), C, pack)
    elif tC >= C and tT < T:
        tT = _fit_tile(max(rows_budget // max(tC, 1), base), T, pack)
    return tC, tT


def _copy_kernel(x_ref, o_ref):
    # Variant A: the (C, T) swap is done entirely by the BlockSpec index maps
    # (strided DMA); the kernel body is 1 vld + 1 vst per vreg, lane-dense.
    o_ref[...] = x_ref[...]


def _swap_kernel(x_ref, o_ref):
    # Variant B: x_ref block (tC, tT, D) -> o_ref block (tT, tC, D).
    # The lane axis D is untouched; only sublane re-blocking inside VMEM.
    o_ref[...] = jnp.swapaxes(x_ref[...], 0, 1)


def _transposer_pallas(x: jax.Array, *, dma_transpose: bool | None = None) -> jax.Array:
    B, C, T, D = x.shape
    dtype = x.dtype
    itemsize = jnp.dtype(dtype).itemsize
    pack = _sublane_pack(dtype)
    row_bytes = max(D * itemsize, 1)

    vmem_cap = _vmem_capacity_bytes()
    # ~1/16 of VMEM per block: with input + output double-buffered that keeps
    # ~1/4 of VMEM in live block buffers (8 MiB blocks on v5e/v6e, 4 on v7x).
    target_block = int(min(8 << 20, max(2 << 20, vmem_cap // 16)))
    # Scoped-VMEM request: 64 MiB where physical VMEM is 128 MiB (v5e/v6e),
    # 48 MiB on v7x's 64 MiB parts (headroom for compiler-internal scratch).
    vmem_limit = int(min(64 << 20, (vmem_cap * 3) // 4))

    if dma_transpose is None:
        # Pure-DMA transpose wants lane-aligned D (unmasked vst), write runs of
        # >= ~512 B, and enough T rows to amortize per-grid-step overhead.
        dma_transpose = (
            D % 128 == 0 and row_bytes >= 512 and T * row_bytes >= 256 * 1024
        )

    bytes_accessed = 2 * x.size * itemsize  # read everything once, write once
    cost = pl.CostEstimate(flops=0, transcendentals=0, bytes_accessed=bytes_accessed)
    cparams = pltpu.CompilerParams(
        dimension_semantics=("parallel", "parallel", "parallel"),
        vmem_limit_bytes=vmem_limit,
    )

    if dma_transpose:
        # ---- Variant A: identity-copy kernel; transpose done by the DMA. ----
        # Output is written as a flattened (B, T, C*D) array so the per-channel
        # block (tT, D) stays lane-dense and fully (8,128)-legal; the final
        # reshape back to (B, T, C, D) is metadata-only.
        tT = _fit_tile(max(target_block // row_bytes, pack), T, pack)
        if B == 1 and _cdiv(T, tT) * C < 2 and T >= 2 * pack:
            tT = _fit_tile(_cdiv(T, 2), T, pack)  # give both v7x cores work
        grid = (B, _cdiv(T, tT), C)
        out_flat = pl.pallas_call(
            _copy_kernel,
            out_shape=jax.ShapeDtypeStruct((B, T, C * D), dtype),
            grid_spec=pltpu.PrefetchScalarGridSpec(
                num_scalar_prefetch=0,
                grid=grid,
                in_specs=[
                    pl.BlockSpec((None, None, tT, D), lambda b, t, c: (b, c, t, 0)),
                ],
                out_specs=pl.BlockSpec((None, tT, D), lambda b, t, c: (b, t, c)),
            ),
            compiler_params=cparams,
            cost_estimate=cost,
        )(x)
        return out_flat.reshape(B, T, C, D)

    # ---- Variant B: in-kernel (tC,tT,D) -> (tT,tC,D) sublane re-blocking. ----
    tC, tT = _balanced_tiles(C, T, row_bytes, pack, target_block)
    if B == 1 and _cdiv(T, tT) * _cdiv(C, tC) < 2:
        if T >= 2 * pack:
            tT = _fit_tile(_cdiv(T, 2), T, pack)
        elif C >= 2 * pack:
            tC = _fit_tile(_cdiv(C, 2), C, pack)
    grid = (B, _cdiv(T, tT), _cdiv(C, tC))
    return pl.pallas_call(
        _swap_kernel,
        out_shape=jax.ShapeDtypeStruct((B, T, C, D), dtype),
        grid_spec=pltpu.PrefetchScalarGridSpec(
            num_scalar_prefetch=0,
            # C-tile axis innermost so consecutive output writebacks land in
            # adjacent HBM regions.
            grid=grid,
            in_specs=[
                pl.BlockSpec((None, tC, tT, D), lambda b, t, c: (b, c, t, 0)),
            ],
            out_specs=pl.BlockSpec((None, tT, tC, D), lambda b, t, c: (b, t, c, 0)),
        ),
        compiler_params=cparams,
        cost_estimate=cost,
    )(x)


def transposer(x: jax.Array, *, force_pallas: bool = False) -> jax.Array:
    """Pallas equivalent of Transposer.forward: swap axes 1 and 2 of a 4-D array."""
    if x.ndim != 4:
        return jnp.swapaxes(x, 1, 2)
    B, C, T, D = x.shape
    itemsize = jnp.dtype(x.dtype).itemsize
    if not force_pallas:
        tiny = x.size * itemsize < (1 << 20)
        # Lane-density based dispatch (review): only lane-sparse *and* narrow D
        # falls back; bf16/fp8 D=128/256 stay on the Pallas path.
        narrow = (D % 128 != 0) and (D * itemsize < 512)
        # TODO(synk): tile D for extremely wide feature dims instead of falling back.
        huge_rows = _sublane_pack(x.dtype) ** 2 * D * itemsize > (8 << 20)
        if tiny or narrow or huge_rows:
            return jnp.swapaxes(x, 1, 2)
    return _transposer_pallas(x)


if __name__ == "__main__":
    key = jax.random.PRNGKey(0)
    k1, k2, k3 = jax.random.split(key, 3)

    # (batch, channels, seq, feat) as the module's forward implies.
    B, C, T, D = 2, 4, 16, 16
    x = jax.random.normal(k1, (B, C, T, D), dtype=jnp.float32)
    y = jax.block_until_ready(transposer(x, force_pallas=True))  # narrow D -> in-kernel swap
    y_ref = jnp.swapaxes(x, 1, 2)
    assert y.shape == (B, T, C, D), y.shape
    assert y.dtype == x.dtype
    assert jnp.array_equal(y, y_ref), "mismatch vs. reference (f32, in-kernel swap)"

    # Lane-aligned bf16 shape exercising the in-kernel-swap variant (256 B rows).
    x2 = jax.random.normal(k2, (2, 16, 32, 128)).astype(jnp.bfloat16)
    y2 = jax.block_until_ready(_transposer_pallas(x2, dma_transpose=False))
    assert jnp.array_equal(y2, jnp.swapaxes(x2, 1, 2)), "mismatch (bf16, in-kernel swap)"

    # Lane-aligned f32 shape exercising the pure-DMA identity-copy variant.
    x3 = jax.random.normal(k3, (2, 4, 24, 128), dtype=jnp.float32)
    y3 = jax.block_until_ready(_transposer_pallas(x3, dma_transpose=True))
    assert jnp.array_equal(y3, jnp.swapaxes(x3, 1, 2)), "mismatch (f32, DMA transpose)"

    # Auto-dispatch path (tiny / lane-sparse shapes fall back to jnp.swapaxes).
    y4 = jax.block_until_ready(transposer(x))
    assert jnp.array_equal(y4, y_ref)

    print("KERNEL_OK")
</pallas_src>

<mosaic_0001>
module attributes {stable_mosaic.version = 11 : i64} {
  func.func @_swap_kernel(%arg0: i32, %arg1: i32, %arg2: i32, %arg3: memref<1x4x16x16xf32, #tpu.memory_space<vmem>>, %arg4: memref<1x16x4x16xf32, #tpu.memory_space<vmem>>) attributes {dimension_semantics = [#tpu.dimension_semantics<parallel>, #tpu.dimension_semantics<parallel>, #tpu.dimension_semantics<parallel>], iteration_bounds = array<i64: 2, 1, 1>, scalar_prefetch = 0 : i64, scratch_operands = 0 : i64, tpu.core_type = #tpu.core_type<tc>, window_params = [{transform_indices = @transform_0, window_bounds = array<i64: 1, 4, 16, 16>}, {transform_indices = @transform_1, window_bounds = array<i64: 1, 16, 4, 16>}]} {
    %c0 = arith.constant 0 : index
    %c0_0 = arith.constant 0 : index
    %c0_1 = arith.constant 0 : index
    %c0_2 = arith.constant 0 : index
    %0 = vector.load %arg3[%c0, %c0_0, %c0_1, %c0_2] : memref<1x4x16x16xf32, #tpu.memory_space<vmem>>, vector<1x4x16x16xf32>
    %1 = vector.shape_cast %0 : vector<1x4x16x16xf32> to vector<4x16x16xf32>
    %2 = tpu.transpose %1, [1, 0, 2] : vector<4x16x16xf32> -> vector<16x4x16xf32>
    %c0_3 = arith.constant 0 : index
    %c0_4 = arith.constant 0 : index
    %c0_5 = arith.constant 0 : index
    %c0_6 = arith.constant 0 : index
    %3 = vector.load %arg4[%c0_3, %c0_4, %c0_5, %c0_6] : memref<1x16x4x16xf32, #tpu.memory_space<vmem>>, vector<1x16x4x16xf32>
    %4 = vector.shape_cast %3 : vector<1x16x4x16xf32> to vector<16x4x16xf32>
    %5 = vector.shape_cast %2 : vector<16x4x16xf32> to vector<1x16x4x16xf32>
    tpu.vector_store %arg4[%c0_3, %c0_4, %c0_5, %c0_6], %5 {strides = array<i32>} : memref<1x16x4x16xf32, #tpu.memory_space<vmem>>, vector<1x16x4x16xf32>,
    return
  }
  func.func @transform_0(%arg0: i32, %arg1: i32, %arg2: i32) -> (i32, i32, i32, i32) {
    %c0_i32 = arith.constant 0 : i32
    %c0_i32_0 = arith.constant 0 : i32
    return %arg0, %arg2, %arg1, %c0_i32 : i32, i32, i32, i32
  }
  func.func @transform_1(%arg0: i32, %arg1: i32, %arg2: i32) -> (i32, i32, i32, i32) {
    %c0_i32 = arith.constant 0 : i32
    %c0_i32_0 = arith.constant 0 : i32
    return %arg0, %arg1, %arg2, %c0_i32 : i32, i32, i32, i32
  }
}

</mosaic_0001>

<bundles_post_ra>
// kernel: tpu_custom_call.1
= control target key start
LH: loop header
LB: loop body
LE: loop exit
PB: predicated region body
PF: predicated region fallthrough
CT: control target
= control target key end

     0   :  { %6 = vsyncpa [#allocation3], 0  ;;  %s855_s0 = inlined_call_operand.hbm [shape: f32[2,4,16,16], index: 0, kind: input, shape index: {}]   ;;  %s856_s1 = inlined_call_operand.hbm [shape: f32[2,16,4,16], index: 1, kind: output, shape index: {}]  }
   0x1   :  { %8 = vsyncpa [#allocation3 + $0x1], 0 }
   0x2   :  { %9 = vsyncpa [#allocation4], 0 }
   0x3   :  { %11 = vsyncpa [#allocation4 + $0x1], 0  ;;  %s660_s6 = smov 0   ;;  %s662_s7 = smov 0  }
   0x4   :  { %s664_s8 = smov 0   ;;  %s666_s9 = smov 0  }
   0x5   :  { %s668_s10 = smov 0   ;;  %s670_s11 = smov 0  }
   0x6 LB: > { %s441_s12 = sadd.s32 4294967295, %s639_s11   ;;  %s442_s13 = sadd.s32 4294967294, %s639_s11   ;;  %s639_s11 = sphi %s670_s11, %s17_s11   ;;  %s635_s10 = sphi %s668_s10, %s871_s10   ;;  %s631_s9 = sphi %s666_s9, %s870_s9   ;;  %s627_s8 = sphi %s664_s8, %s869_s8   ;;  %s623_s7 = sphi %s662_s7, %s868_s7   ;;  %s619_s6 = sphi %s660_s6, %s867_s6  }
   0x7   : > { %s36_s14 = sadd.s32 1, %s635_s10  ;;  %s47_s15 = sadd.s32 1, %s627_s8 }
   0x8   : > { %p38_p0 = scmp.ge.s32.totalorder %s36_s14, 2  ;;  %p54_p1 = scmp.ne.s32.totalorder %s627_s8, %s623_s7 }
   0x9   : > { %p55_p2 = scmp.eq.s32.totalorder %s639_s11, 0  ;;  %p60_p3 = scmp.ne.s32.totalorder %s623_s7, %s619_s6 }
   0xa   : > { %s873_s14 = smov (%p38_p0, %s36_s14), 0  ;;  %p61_p5 = scmp.eq.s32.totalorder %s441_s12, 0 }
   0xb   : > { %p701_p4 = por %p55_p2, %p54_p1  ;;  %s40_s17 = ssub.s32 %s635_s10, %s873_s14 }
   0xc   : > { %p88_p6 = scmp.eq.s32.totalorder %s441_s12, 1  ;;  %p45_p7 = scmp.eq.s32.totalorder %s40_s17, 0 }
   0xd   : > { %p707_p8 = por %p61_p5, %p60_p3  ;;  %p94_p10 = scmp.eq.s32.totalorder %s442_s13, 1 }
   0xe   : > { %p711_p9 = por %p88_p6, %p54_p1  ;;  %p470_p13 = scmp.lt.s32.totalorder %s639_s11, 2 }
   0xf   : > { %s716_s20 = scalar_select %p45_p7, %s627_s8, %s47_s15  }
  0x10   : > { %s860_s19 = scalar_select %p711_p9, 1, 0 }
  0x11   : > { %p718_p11 = por %p94_p10, %p60_p3  ;;  %s114_s22 = sand.u32 1, %s627_s8  }
  0x12   : > { %s445_s23 = sshll.u32 %s114_s22, 6  ;;  %s456_s24 = sshll.u32 %s635_s10, 10 }
  0x13   : > { %s861_s21 = scalar_select %p718_p11, 1, 0 }
  0x14   : > { %s729_s27 = scalar_lea.hbm %s855_s0, %s456_s24  ;;  %s118_s28 = scalar_lea.vmem [#allocation2], %s445_s23 }
  0x15   : > { %s130_s29 = sshll.u32 %s118_s28, 4  ;;  %p735_p0 = pnand %p470_p13, %p701_p4  ;;  %s731_s29 = int_to_ptr.vmem [resolvable:$true] %s130_s29 }
  0x16   : > { %s740_s2 = scalar_lea.sflag [#allocation3], %s114_s22  ;;  %s527_s3 = scalar_lea.hbm %s729_s27, 1024 }
  0x17   : > { %p528_p2 = scmp.ne.s32.totalorder %s729_s27, %s527_s3  ;;  %p529_p3 = pneg %p735_p0 }
  0x18   : > { %s532_s12 = scalar_lea.hbm %s855_s0, 2048  ;;  %p533_p4 = scmp.lt.u32.totalorder %s729_s27, %s855_s0 }
  0x19   : > { %p530_p5 = pnand %p529_p3, %p528_p2  ;;  %p534_p7 = scmp.lt.u32.totalorder %s532_s12, %s527_s3 }
  0x1a   : > { %p536_p13 = scmp.lt.u32.totalorder %s527_s3, %s729_s27 }
  0x1b   : > { %p531_p6 = pneg %p530_p5  ;;  %p535_p10 = por %p534_p7, %p533_p4 }
  0x1d   : > { %p537_p12 = por %p536_p13, %p535_p10 }
  0x1f   : > { %p538_p1 = pnand %p537_p12, %p531_p6 }
  0x21   : > { %541 = shalt.err (!%p538_p1)
}
  0x22   : > { %s542_s16 = scalar_lea.vmem %s731_s29, 1024  ;;  %s641_s17 = smov [#allocation2]  }
  0x23   : > { %p543_p2 = scmp.ne.s32.totalorder %s731_s29, %s542_s16  ;;  %s547_s22 = sshll.u32 %s641_s17, 4  ;;  %s548_s22 = int_to_ptr.vmem [resolvable:$false] %s547_s22 }
  0x24   : > { %s549_s23 = scalar_lea.vmem %s548_s22, 2048  ;;  %p550_p9 = scmp.lt.s32.totalorder %s731_s29, %s548_s22 }
  0x25   : > { %p545_p5 = pnand %p543_p2, %p529_p3  ;;  %p551_p4 = scmp.lt.s32.totalorder %s549_s23, %s542_s16 }
  0x27   : > { %p546_p11 = pneg %p545_p5  ;;  %p552_p7 = por %p551_p4, %p550_p9 }
  0x29   : > { %p553_p10 = pnand %p552_p7, %p546_p11 }
  0x2b   : > { %556 = shalt.err (!%p553_p10)
}
  0x2c   : > { %s642_s24 = smov 128   ;;  %s643_s25 = smov 8  }
  0x2d   : > { %465 = dma.hbm_to_vmem [thread:$0]  (!%p735_p0), %s729_s27, 1024, %s731_s29, %s740_s2, %s642_s24, %s642_s24, %s643_s25  }
  0x2e   : > { %p138_p12 = scmp.lt.s32.totalorder %s639_s11, 3  ;;  %p863_p1 = scmp.ge.s32.totalorder %s639_s11, 1 }
  0x30   : > { %p139_p3 = pnand %p863_p1, %p138_p12 }
  0x31   : > { %s772_s26 = sand.u32 (!%p139_p3), 1, %s623_s7  }
  0x32   : > { %142 = sbr.rel (%p139_p3) target bundleno = 93 (0x5d), region = 24  ;;  %s449_s28 = sshll.u32 (!%p139_p3), %s772_s26, 6 }
  0x33   : > { %s145_s3 = scalar_lea.sflag (!%p139_p3), [#allocation3], %s772_s26  ;;  %s148_s4 = scalar_lea.vmem (!%p139_p3), [#allocation2], %s449_s28 }
  0x39   : > { %610 = dma.done.wait (%p707_p8), %s145_s3, 1024  }
  0x3a   : > { %612 = vsyncadd (%p707_p8), %s145_s3, 4294966272  ;;  %v183_v0 = vlaneseq  ;;  %v644_v1 = vmov 1983009808   ;;  %v645_v3 = vmov 1934713408   ;;  %v170_v9 = vld [vmem:[%s148_s4] sm:$0xff] }
  0x3b   : > { %v181_v2 = vunpack.c.l.s4 %v644_v1  ;;  %v213_v4 = vunpack.c.l.s4 %v645_v3  ;;  %v172_v10 = vld [vmem:[%s148_s4 + $0x10] sm:$0xff]  ;;  %v174_v11 = vld [vmem:[%s148_s4 + $0x20] sm:$0xff]  ;;  %v171_v15 = vld [vmem:[%s148_s4 + $0x8] sm:$0xff]  ;;  %vm314_vm0 = vcmask 125952   ;;  %s457_s18 = sshll.u32 %s631_s9, 10  ;;  %s166_s27 = scalar_lea.vmem [#allocation5], %s449_s28 }
  0x3c   : > { %v184_v5 = vshrl.u32 %v183_v0, 7  ;;  %v176_v12 = vld [vmem:[%s148_s4 + $0x30] sm:$0xff]  ;;  %v178_v13 = vcombine.low %v170_v9, %v174_v11  ;;  %v179_v14 = vcombine.high %v170_v9, %v174_v11  ;;  %v173_v16 = vld [vmem:[%s148_s4 + $0x18] sm:$0xff]  ;;  %v175_v20 = vld [vmem:[%s148_s4 + $0x28] sm:$0xff]  ;;  %s348_s29 = sshll.u32 %s166_s27, 4  ;;  %v646_v48 = vmov 0.0   ;;  %s798_s2 = scalar_lea.hbm %s856_s1, %s457_s18  ;;  %s800_s29 = int_to_ptr.vmem [resolvable:$true] %s348_s29 }
  0x3d   : > { %v182_v6 = vunpack.c.0.s8 %v181_v2  ;;  %v214_v7 = vunpack.c.0.s8 %v213_v4  ;;  %v194_v17 = vcombine.low %v172_v10, %v176_v12  ;;  %v195_v19 = vcombine.high %v172_v10, %v176_v12  ;;  %v177_v21 = vld [vmem:[%s148_s4 + $0x38] sm:$0xff]  ;;  %s332_s5 = scalar_lea.sflag [#allocation4], %s772_s26  ;;  %s557_s12 = scalar_lea.vmem %s800_s29, 1024 }
  0x3e   : > { %v246_v24 = vcombine.low %v171_v15, %v175_v20  ;;  %v262_v25 = vcombine.low %v173_v16, %v177_v21  ;;  %v247_v28 = vcombine.high %v171_v15, %v175_v20  ;;  %v263_v29 = vcombine.high %v173_v16, %v177_v21  ;;  %p558_p8 = scmp.ne.s32.totalorder %s800_s29, %s557_s12  ;;  %p864_p9 = scmp.ne.s32.totalorder %s860_s19, 0 }
  0x3f   : > { %v185_v8 = vsub.s32 %v182_v6, %v184_v5  ;;  %v217_v18 = vsub.s32 %v214_v7, %v184_v5  ;;  %s647_s13 = smov [#allocation5]  }
  0x40   : > { %p559_p11 = pnand %p558_p8, %p864_p9  ;;  %s561_s15 = sshll.u32 %s647_s13, 4  ;;  %s562_s15 = int_to_ptr.vmem [resolvable:$false] %s561_s15 }
  0x41   : > { %v186_v22 = vrot.slane %v178_v13, %v185_v8  ;;  %v193_v23 = vrot.slane %v179_v14, %v185_v8  ;;  %v202_v26 = vrot.slane %v194_v17, %v185_v8  ;;  %v209_v27 = vrot.slane %v195_v19, %v185_v8  ;;  %s563_s16 = scalar_lea.vmem %s562_s15, 2048  ;;  %p564_p6 = scmp.lt.s32.totalorder %s800_s29, %s562_s15 }
  0x42   : > { %v254_v30 = vrot.slane %v246_v24, %v185_v8  ;;  %v270_v31 = vrot.slane %v262_v25, %v185_v8  ;;  %v261_v38 = vrot.slane %v247_v28, %v185_v8  ;;  %v277_v39 = vrot.slane %v263_v29, %v185_v8  ;;  %p560_p0 = pneg %p559_p11  ;;  %p565_p13 = scmp.lt.s32.totalorder %s563_s16, %s557_s12 }
  0x43   : > { %v210_v32 = vcombine.low %v186_v22, %v202_v26  ;;  %v211_v33 = vcombine.high %v186_v22, %v202_v26  ;;  %v226_v34 = vcombine.low %v193_v23, %v209_v27  ;;  %v227_v35 = vcombine.high %v193_v23, %v209_v27 }
  0x44   : > { %v278_v36 = vcombine.low %v254_v30, %v270_v31  ;;  %v279_v37 = vcombine.high %v254_v30, %v270_v31  ;;  %v294_v46 = vcombine.low %v261_v38, %v277_v39  ;;  %v295_v47 = vcombine.high %v261_v38, %v277_v39  ;;  %p566_p2 = por %p565_p13, %p564_p6 }
  0x45   : > { %v218_v40 = vrot.slane %v210_v32, %v217_v18  ;;  %v225_v41 = vrot.slane %v211_v33, %v217_v18  ;;  %v234_v42 = vrot.slane %v226_v34, %v217_v18  ;;  %v241_v43 = vrot.slane %v227_v35, %v217_v18 }
  0x46   : > { %v286_v44 = vrot.slane %v278_v36, %v217_v18  ;;  %v293_v45 = vrot.slane %v279_v37, %v217_v18  ;;  %v302_v55 = vrot.slane %v294_v46, %v217_v18  ;;  %v309_v56 = vrot.slane %v295_v47, %v217_v18  ;;  %p567_p5 = pnand %p566_p2, %p560_p0 }
  0x47   : > { %315 = vst.msk [vmem:[%s166_s27] sm:$0xf] %vm314_vm0, %v218_v40  ;;  %v242_v49 = vcombine.high %v218_v40, %v646_v48  ;;  %317 = vst.msk [vmem:[%s166_s27 + $0x8] sm:$0xf] %vm314_vm0, %v225_v41  ;;  %v243_v50 = vcombine.high %v225_v41, %v646_v48  ;;  %v244_v51 = vcombine.high %v234_v42, %v646_v48 }
  0x48   : > { %319 = vst.msk [vmem:[%s166_s27 + $0x10] sm:$0xf] %vm314_vm0, %v234_v42  ;;  %321 = vst.msk [vmem:[%s166_s27 + $0x18] sm:$0xf] %vm314_vm0, %v241_v43  ;;  %v245_v52 = vcombine.high %v241_v43, %v646_v48  ;;  %v310_v53 = vcombine.high %v286_v44, %v646_v48  ;;  %v311_v54 = vcombine.high %v293_v45, %v646_v48 }
  0x49   : > { %323 = vst.msk [vmem:[%s166_s27 + $0x20] sm:$0xf] %vm314_vm0, %v286_v44  ;;  %325 = vst.msk [vmem:[%s166_s27 + $0x28] sm:$0xf] %vm314_vm0, %v293_v45  ;;  %v312_v57 = vcombine.high %v302_v55, %v646_v48  ;;  %v313_v58 = vcombine.high %v309_v56, %v646_v48 }
  0x4a   : > { %316 = vst.msk [vmem:[%s166_s27 + $0x4] sm:$0xf] %vm314_vm0, %v242_v49  ;;  %318 = vst.msk [vmem:[%s166_s27 + $0xc] sm:$0xf] %vm314_vm0, %v243_v50 }
  0x4b   : > { %320 = vst.msk [vmem:[%s166_s27 + $0x14] sm:$0xf] %vm314_vm0, %v244_v51  ;;  %322 = vst.msk [vmem:[%s166_s27 + $0x1c] sm:$0xf] %vm314_vm0, %v245_v52 }
  0x4c   : > { %324 = vst.msk [vmem:[%s166_s27 + $0x24] sm:$0xf] %vm314_vm0, %v310_v53  ;;  %326 = vst.msk [vmem:[%s166_s27 + $0x2c] sm:$0xf] %vm314_vm0, %v311_v54 }
  0x4d   : > { %327 = vst.msk [vmem:[%s166_s27 + $0x30] sm:$0xf] %vm314_vm0, %v302_v55  ;;  %329 = vst.msk [vmem:[%s166_s27 + $0x38] sm:$0xf] %vm314_vm0, %v309_v56 }
  0x4e   : > { %328 = vst.msk [vmem:[%s166_s27 + $0x34] sm:$0xf] %vm314_vm0, %v312_v57  ;;  %330 = vst.msk [vmem:[%s166_s27 + $0x3c] sm:$0xf] %vm314_vm0, %v313_v58 }
  0x4f   : > { %570 = shalt.err (!%p567_p5)
}
  0x50   : > { %s571_s17 = scalar_lea.hbm %s798_s2, 1024  ;;  %s575_s24 = scalar_lea.hbm %s856_s1, 2048 }
  0x51   : > { %p572_p4 = scmp.ne.s32.totalorder %s798_s2, %s571_s17  ;;  %p576_p12 = scmp.lt.u32.totalorder %s798_s2, %s856_s1 }
  0x52   : > { %p577_p1 = scmp.lt.u32.totalorder %s575_s24, %s571_s17  ;;  %p579_p8 = scmp.lt.u32.totalorder %s571_s17, %s798_s2 }
  0x53   : > { %p573_p7 = pnand %p572_p4, %p864_p9 }
  0x54   : > { %p578_p3 = por %p577_p1, %p576_p12 }
  0x55   : > { %p574_p10 = pneg %p573_p7 }
  0x56   : > { %p580_p11 = por %p579_p8, %p578_p3 }
  0x58   : > { %p581_p0 = pnand %p580_p11, %p574_p10 }
  0x5a   : > { %584 = shalt.err (!%p581_p0)
}
  0x5b   : > { %s648_s3 = smov 64   ;;  %s649_s4 = smov 4  }
  0x5c   : > { %460 = dma.vmem_to_hbm [thread:$0]  (%p864_p9), %s800_s29, 1024, %s798_s2, %s332_s5, %s648_s3, %s648_s3, %s649_s4  }
  0x5d PF: > { %s363_s18 = sand.u32 1, %s619_s6   ;;  %p865_p6 = scmp.ne.s32.totalorder %s861_s21, 0 }
  0x5e   : > { %p866_p13 = scmp.ge.s32.totalorder %s639_s11, 2  ;;  %s364_s27 = scalar_lea.sflag [#allocation4], %s363_s18 }
  0x60   : > { %p467_p2 = pnand %p866_p13, %p865_p6 }
  0x62   : > { %614 = dma.done.wait (!%p467_p2), %s364_s27, 1024  }
  0x63   : > { %616 = vsyncadd (!%p467_p2), %s364_s27, 4294966272  ;;  %s17_s11 = sadd.s32 1, %s639_s11   ;;  %s867_s6 = smov %s623_s7 }
  0x64   : > { %p14_p5 = scmp.ge.s32.totalorder %s17_s11, 4   ;;  %s868_s7 = smov %s627_s8 }
  0x65   : > { %s869_s8 = smov %s716_s20  ;;  %s870_s9 = smov %s635_s10 }
  0x66   : > { %s871_s10 = smov %s873_s14  ;;  %16 = sbr.rel (!%p14_p5) target bundleno = 6 (0x6), region = 69 }
  0x6d   :  { %369 = vsyncpa [#allocation3], 1 }
  0x6e   :  { %371 = vsyncpa [#allocation3 + $0x1], 1 }
  0x6f   :  { %372 = vsyncpa [#allocation4], 1 }
  0x70   :  { %374 = vsyncpa [#allocation4 + $0x1], 1 }

</bundles_post_ra>
